<compile_context>
chip_gen: v5e
topology: v5e:2x2
jax: 0.10.0
libtpu: 0.0.40
codegen_flags: <defaults>
</compile_context>

<pallas_src>
import jax
import jax.numpy as jnp
from jax.experimental import pallas as pl
from jax.experimental.pallas import tpu as pltpu

LRELU_SLOPE = 0.01  # nn.LeakyReLU default negative_slope
# TODO(synk): `mc.activations['lrelu']` is external; assumed to be nn.LeakyReLU(0.01).


def _coord_latent_kernel(xc_ref, hz_ref, wc_ref, out_ref):
    # xc_ref : (Bt, tn, 2)   coordinate block
    # hz_ref : (Bt, 1, O)    per-batch  z @ Wl.T + bc  (precomputed, f32)
    # wc_ref : (2, O)        fc_coord weight, transposed
    # out_ref: (Bt, tn, O)
    xc = xc_ref[...].astype(jnp.float32)
    hz = hz_ref[...].astype(jnp.float32)
    wc = wc_ref[...].astype(jnp.float32)

    x0 = xc[:, :, 0:1]              # (Bt, tn, 1) -> lane-broadcast over O
    x1 = xc[:, :, 1:2]
    w0 = wc[0:1, :][None]           # (1, 1, O)  -> sublane-broadcast over tn
    w1 = wc[1:2, :][None]

    h = x0 * w0 + x1 * w1 + hz                 # (Bt, tn, O): pure VPU broadcast FMAs
    h = jnp.where(h > 0, h, LRELU_SLOPE * h)   # leaky relu
    out_ref[...] = h.astype(out_ref.dtype)


def _choose_tiles(B, n, O, itemsize):
    """Pick (Bt, tn) so each grid step writes ~4 MiB of output.

    Big blocks amortize the ~0.35 us per-grid-step overhead; the cap keeps the
    double-buffered in/out blocks comfortably inside v7x's smaller (64 MiB) VMEM.
    """
    target_block_bytes = 4 << 20
    max_rows = max(8, target_block_bytes // max(1, O * itemsize))

    if n <= 8:
        tn = n                                  # block dim == full dim is always legal
    else:
        tn = (min(n, max_rows) // 8) * 8        # multiple of 8 (sublane tiling)

    bt = max(1, min(B, max_rows // max(tn, 1)))

    # If the whole problem would fit in a single grid step, split the batch axis
    # so the two TensorCores of a v7x chip ("parallel" axes) both get work.
    if B > 1 and pl.cdiv(B, bt) * pl.cdiv(n, tn) == 1:
        bt = pl.cdiv(B, 2)
    return bt, tn


def coord_latent_forward(x_coord, z, w_coord, b_coord, w_latent):
    """x_coord: (B, n, 2), z: (B, L), w_coord: (O, 2), b_coord: (O,), w_latent: (O, L)."""
    B, n, _ = x_coord.shape
    O = w_coord.shape[0]
    out_dtype = jnp.result_type(x_coord.dtype, z.dtype, w_coord.dtype)

    # Hoist the per-batch latent projection (M=1 rows) into one XLA matmul and
    # fold the coord bias in; the kernel is then a pure streaming elementwise op.
    hz = (jnp.dot(z, w_latent.T, preferred_element_type=jnp.float32)
          + b_coord.astype(jnp.float32)).reshape(B, 1, O)
    wc_t = w_coord.T                                  # (2, O)

    bt, tn = _choose_tiles(B, n, O, jnp.dtype(out_dtype).itemsize)
    grid = (pl.cdiv(B, bt), pl.cdiv(n, tn))

    out = pl.pallas_call(
        _coord_latent_kernel,
        out_shape=jax.ShapeDtypeStruct((B, n, O), out_dtype),
        grid_spec=pltpu.PrefetchScalarGridSpec(
            num_scalar_prefetch=0,
            grid=grid,
            in_specs=[
                pl.BlockSpec((bt, tn, 2), lambda b, i: (b, i, 0)),
                pl.BlockSpec((bt, 1, O), lambda b, i: (b, 0, 0)),
                pl.BlockSpec((2, O), lambda b, i: (0, 0)),
            ],
            out_specs=pl.BlockSpec((bt, tn, O), lambda b, i: (b, i, 0)),
        ),
        compiler_params=pltpu.CompilerParams(
            dimension_semantics=("parallel", "parallel"),
            vmem_limit_bytes=32 * 1024 * 1024,
        ),
    )(x_coord, hz, wc_t)

    # (B, n, O) -> (B*n, O) is a free reshape (identical element order).
    return out.reshape(B * n, O)


def coord_latent_reference(x_coord, z, w_coord, b_coord, w_latent):
    B, n, _ = x_coord.shape
    h_x = x_coord.reshape(B * n, 2) @ w_coord.T + b_coord
    h_x = h_x.reshape(B, n, -1)
    h_z = z @ w_latent.T
    h = h_x + h_z[:, None, :]
    h = h.reshape(B * n, -1)
    return jnp.where(h > 0, h, LRELU_SLOPE * h)


if __name__ == "__main__":
    B, n, latent_dim, out_dim = 2, 8, 4, 32

    key = jax.random.PRNGKey(0)
    k1, k2, k3, k4, k5 = jax.random.split(key, 5)

    x_coord = jax.random.normal(k1, (B, n, 2), dtype=jnp.float32)
    z = jax.random.normal(k2, (B, latent_dim), dtype=jnp.float32)

    # Deterministic parameter init (shapes follow nn.Linear conventions).
    w_coord = jax.random.normal(k3, (out_dim, 2), dtype=jnp.float32) * 0.5
    b_coord = jax.random.normal(k4, (out_dim,), dtype=jnp.float32) * 0.1
    w_latent = jax.random.normal(k5, (out_dim, latent_dim), dtype=jnp.float32) * 0.5

    out = coord_latent_forward(x_coord, z, w_coord, b_coord, w_latent)
    out = jax.block_until_ready(out)

    ref = coord_latent_reference(x_coord, z, w_coord, b_coord, w_latent)
    assert out.shape == (B * n, out_dim), out.shape
    assert jnp.allclose(out, ref, atol=1e-5, rtol=1e-5), "mismatch vs reference"

    print("KERNEL_OK")
</pallas_src>

<mosaic_0001>
module attributes {stable_mosaic.version = 11 : i64} {
  func.func @_coord_latent_kernel(%arg0: i32, %arg1: i32, %arg2: memref<1x8x2xf32, #tpu.memory_space<vmem>>, %arg3: memref<1x1x32xf32, #tpu.memory_space<vmem>>, %arg4: memref<2x32xf32, #tpu.memory_space<vmem>>, %arg5: memref<1x8x32xf32, #tpu.memory_space<vmem>>) attributes {dimension_semantics = [#tpu.dimension_semantics<parallel>, #tpu.dimension_semantics<parallel>], iteration_bounds = array<i64: 2, 1>, scalar_prefetch = 0 : i64, scratch_operands = 0 : i64, tpu.core_type = #tpu.core_type<tc>, window_params = [{transform_indices = @transform_0, window_bounds = array<i64: 1, 8, 2>}, {transform_indices = @transform_1, window_bounds = array<i64: 1, 1, 32>}, {pipeline_mode = #tpu.pipeline_mode<synchronous>, transform_indices = @transform_2, window_bounds = array<i64: 2, 32>}, {transform_indices = @transform_3, window_bounds = array<i64: 1, 8, 32>}]} {
    %c0 = arith.constant 0 : index
    %c0_0 = arith.constant 0 : index
    %c0_1 = arith.constant 0 : index
    %0 = vector.load %arg2[%c0, %c0_0, %c0_1] : memref<1x8x2xf32, #tpu.memory_space<vmem>>, vector<1x8x2xf32>
    %c0_2 = arith.constant 0 : index
    %c0_3 = arith.constant 0 : index
    %c0_4 = arith.constant 0 : index
    %1 = vector.load %arg3[%c0_2, %c0_3, %c0_4] : memref<1x1x32xf32, #tpu.memory_space<vmem>>, vector<1x1x32xf32>
    %c0_5 = arith.constant 0 : index
    %c0_6 = arith.constant 0 : index
    %2 = vector.load %arg4[%c0_5, %c0_6] : memref<2x32xf32, #tpu.memory_space<vmem>>, vector<2x32xf32>
    %3 = vector.extract_strided_slice %0 {offsets = [0, 0, 0], sizes = [1, 8, 1], strides = [1, 1, 1]} : vector<1x8x2xf32> to vector<1x8x1xf32>
    %4 = vector.extract_strided_slice %0 {offsets = [0, 0, 1], sizes = [1, 8, 1], strides = [1, 1, 1]} : vector<1x8x2xf32> to vector<1x8x1xf32>
    %5 = vector.extract_strided_slice %2 {offsets = [0, 0], sizes = [1, 32], strides = [1, 1]} : vector<2x32xf32> to vector<1x32xf32>
    %6 = vector.shape_cast %5 : vector<1x32xf32> to vector<1x1x32xf32>
    %7 = vector.extract_strided_slice %2 {offsets = [1, 0], sizes = [1, 32], strides = [1, 1]} : vector<2x32xf32> to vector<1x32xf32>
    %8 = vector.shape_cast %7 : vector<1x32xf32> to vector<1x1x32xf32>
    %9 = vector.broadcast %3 : vector<1x8x1xf32> to vector<1x8x32xf32>
    %10 = vector.broadcast %6 : vector<1x1x32xf32> to vector<1x8x32xf32>
    %11 = arith.mulf %9, %10 : vector<1x8x32xf32>
    %12 = vector.broadcast %4 : vector<1x8x1xf32> to vector<1x8x32xf32>
    %13 = vector.broadcast %8 : vector<1x1x32xf32> to vector<1x8x32xf32>
    %14 = arith.mulf %12, %13 : vector<1x8x32xf32>
    %15 = arith.addf %11, %14 : vector<1x8x32xf32>
    %16 = vector.broadcast %1 : vector<1x1x32xf32> to vector<1x8x32xf32>
    %17 = arith.addf %15, %16 : vector<1x8x32xf32>
    %cst = arith.constant 0.000000e+00 : f32
    %18 = vector.broadcast %cst : f32 to vector<1x8x32xf32>
    %19 = arith.cmpf ogt, %17, %18 : vector<1x8x32xf32>
    %cst_7 = arith.constant 0.00999999977 : f32
    %20 = vector.broadcast %cst_7 : f32 to vector<1x8x32xf32>
    %21 = arith.mulf %20, %17 : vector<1x8x32xf32>
    %22 = arith.select %19, %17, %21 : vector<1x8x32xi1>, vector<1x8x32xf32>
    %c0_8 = arith.constant 0 : index
    %c0_9 = arith.constant 0 : index
    %c0_10 = arith.constant 0 : index
    %23 = vector.load %arg5[%c0_8, %c0_9, %c0_10] : memref<1x8x32xf32, #tpu.memory_space<vmem>>, vector<1x8x32xf32>
    tpu.vector_store %arg5[%c0_8, %c0_9, %c0_10], %22 {strides = array<i32>} : memref<1x8x32xf32, #tpu.memory_space<vmem>>, vector<1x8x32xf32>,
    return
  }
  func.func @transform_0(%arg0: i32, %arg1: i32) -> (i32, i32, i32) {
    %c0_i32 = arith.constant 0 : i32
    %c0_i32_0 = arith.constant 0 : i32
    return %arg0, %arg1, %c0_i32 : i32, i32, i32
  }
  func.func @transform_1(%arg0: i32, %arg1: i32) -> (i32, i32, i32) {
    %c0_i32 = arith.constant 0 : i32
    %c0_i32_0 = arith.constant 0 : i32
    %c0_i32_1 = arith.constant 0 : i32
    return %arg0, %c0_i32, %c0_i32_0 : i32, i32, i32
  }
  func.func @transform_2(%arg0: i32, %arg1: i32) -> (i32, i32) {
    %c0_i32 = arith.constant 0 : i32
    %c0_i32_0 = arith.constant 0 : i32
    %c0_i32_1 = arith.constant 0 : i32
    return %c0_i32, %c0_i32_0 : i32, i32
  }
  func.func @transform_3(%arg0: i32, %arg1: i32) -> (i32, i32, i32) {
    %c0_i32 = arith.constant 0 : i32
    %c0_i32_0 = arith.constant 0 : i32
    return %arg0, %arg1, %c0_i32 : i32, i32, i32
  }
}

</mosaic_0001>

<bundles_post_ra>
// kernel: tpu_custom_call.1
= control target key start
LH: loop header
LB: loop body
LE: loop exit
PB: predicated region body
PF: predicated region fallthrough
CT: control target
= control target key end

     0   :  { %8 = vsyncpa [#allocation3], 0  ;;  %s604_s0 = inlined_call_operand.vmem [shape: f32[2,8,2], index: 0, kind: input, shape index: {}]   ;;  %s605_s1 = inlined_call_operand.vmem [shape: f32[2,1,32], index: 1, kind: input, shape index: {}]   ;;  %s606_s2 = inlined_call_operand.vmem [shape: f32[2,32], index: 2, kind: input, shape index: {}]   ;;  %s607_s3 = inlined_call_operand.hbm [shape: f32[2,8,32], index: 3, kind: output, shape index: {}]  }
   0x1   :  { %10 = vsyncpa [#allocation3 + $0x1], 0  ;;  %s501_s12 = smov 0   ;;  %s503_s13 = smov 0  }
   0x2   :  { %s505_s14 = smov 0   ;;  %s507_s15 = smov 0  }
   0x3   :  { %s509_s16 = smov 0   ;;  %s511_s17 = smov 0  }
   0x4 LB: > { %s328_s18 = sadd.s32 4294967295, %s477_s17   ;;  %s329_s19 = sadd.s32 4294967294, %s477_s17   ;;  %s477_s17 = sphi %s511_s17, %s16_s17   ;;  %s473_s16 = sphi %s509_s16, %s614_s16   ;;  %s469_s15 = sphi %s507_s15, %s613_s15   ;;  %s465_s14 = sphi %s505_s14, %s612_s14   ;;  %s461_s13 = sphi %s503_s13, %s611_s13   ;;  %s457_s12 = sphi %s501_s12, %s610_s12  }
   0x5   : > { %s28_s20 = sadd.s32 1, %s473_s16  ;;  %s112_s21 = sadd.s32 1, %s465_s14 }
   0x6   : > { %p30_p0 = scmp.ge.s32.totalorder %s28_s20, 2  ;;  %p122_p1 = scmp.ne.s32.totalorder %s465_s14, %s461_s13 }
   0x7   : > { %p123_p2 = scmp.eq.s32.totalorder %s328_s18, 1  ;;  %p128_p3 = scmp.ne.s32.totalorder %s461_s13, %s457_s12 }
   0x8   : > { %s616_s20 = smov (%p30_p0, %s28_s20), 0  ;;  %p129_p5 = scmp.eq.s32.totalorder %s329_s19, 1 }
   0x9   : > { %p541_p4 = por %p123_p2, %p122_p1  ;;  %s107_s23 = ssub.s32 %s473_s16, %s616_s20 }
   0xa   : > { %p332_p6 = scmp.ge.s32.totalorder %s477_s17, 1  ;;  %p110_p7 = scmp.eq.s32.totalorder %s107_s23, 0 }
   0xb   : > { %p548_p8 = por %p129_p5, %p128_p3  ;;  %p166_p9 = scmp.lt.s32.totalorder %s477_s17, 3 }
   0xc   : > { %s554_s25 = scalar_select %p110_p7, %s465_s14, %s112_s21  }
   0xd   : > { %p167_p10 = pnand %p332_p6, %p166_p9 }
   0xe   : > { %p195_p11 = scmp.lt.s32.totalorder (!%p167_p10), %s469_s15, 1  ;;  %s192_s9 = sand.u32 (!%p167_p10), 1, %s461_s13  }
   0xf   : > { %170 = sbr.rel (%p167_p10) target bundleno = 161 (0xa1), region = 32  ;;  %s333_s10 = sshll.u32 (!%p167_p10), %s192_s9, 3 }
  0x10   : > { %s336_s11 = sshll.u32 (!%p167_p10), %s469_s15, 3  ;;  %s194_s23 = scalar_lea.vmem (!%p167_p10), [#allocation2], %s333_s10 }
  0x11   : > { %s243_s21 = scalar_lea.hbm (!%p167_p10), %s607_s3, %s336_s11  ;;  %s419_s5 = scalar_lea.hbm (!%p167_p10), %s607_s3, 16 }
  0x14   : > { %v479_v0 = vmov 0   ;;  %s196_s26 = scalar_select %p195_p11, %s469_s15, 1  ;;  %v480_v2 = vmov 1   ;;  %v207_v4 = vld [vmem:[%s606_s2] sm:$0x3]  ;;  %vm229_vm1 = vcmask 261120  }
  0x15   : > { %396 = vset.pattern.permute.xlu0 %v479_v0  ;;  %v213_v5 = vperm.slane %v207_v4, 0  ;;  %v219_v6 = vperm.slane %v207_v4, 1  ;;  %s232_s15 = scalar_lea.sflag [#allocation3], %s192_s9 }
  0x16   : > { %s334_s27 = sshll.u32 %s196_s26, 3  ;;  %s204_s30 = scalar_lea.vmem %s605_s1, %s196_s26 }
  0x17   : > { %s201_s6 = scalar_lea.vmem %s604_s0, %s334_s27  ;;  %v398_v8 = vld [vmem:[%s204_s30] ss:$0 sm:$0xff]  ;;  %s245_s26 = sshll.u32 %s194_s23, 4  ;;  %s246_s26 = int_to_ptr.vmem [resolvable:$true] %s245_s26 }
  0x18   : > { %v205_v1 = vld [vmem:[%s201_s6] sm:$0xff]  ;;  %s247_s27 = sshll.u32 %s243_s21, 4  ;;  %s248_s27 = int_to_ptr.hbm [resolvable:$true] %s247_s27 }
  0x19   : > { %210 = vperm.xlu0 %396, %v205_v1   ;;  %s413_s28 = sshra.s32 %s248_s27, 4  ;;  %s414_s28 = int_to_ptr.hbm [resolvable:$true] %s413_s28 }
  0x1a   : > { %s415_s29 = scalar_lea.hbm %s414_s28, 8  ;;  %p420_p1 = scmp.lt.s32.totalorder %s414_s28, %s607_s3 }
  0x1b   : > { %p416_p12 = scmp.ne.s32.totalorder %s414_s28, %s415_s29  ;;  %p421_p2 = scmp.lt.s32.totalorder %s419_s5, %s415_s29 }
  0x1d   : > { %p417_p13 = pnand %p416_p12, %p541_p4  ;;  %p422_p3 = por %p421_p2, %p420_p1 }
  0x1f   : > { %p418_p0 = pneg %p417_p13 }
  0x21   : > { %397 = vset.pattern.permute.xlu0 %v480_v2  ;;  %p423_p5 = pnand %p422_p3, %p418_p0 }
  0x22   : > { %216 = vperm.xlu0 %397, %v205_v1  }
  0x8b   : > { %v211_v3 = vpop.permute.xlu0 %210 }
  0x8c   : > { %v214_v9 = vmul.f32 %v213_v5, %v211_v3 }
  0x94   : > { %v217_v7 = vpop.permute.xlu0 %216 }
  0x95   : > { %v220_v10 = vmul.f32 %v219_v6, %v217_v7 }
  0x97   : > { %v221_v11 = vadd.f32 %v220_v10, %v214_v9 }
  0x99   : > { %v225_v12 = vadd.f32 %v398_v8, %v221_v11 }
  0x9b   : > { %v227_v13 = vmul.f32 0.01, %v225_v12  ;;  %vm226_vm0 = vcmp.gt.f32.partialorder %v225_v12, 0.0 }
  0x9d   : > { %v228_v14 = vsel %vm226_vm0, %v225_v12, %v227_v13 }
  0x9e   : > { %230 = vst.msk [vmem:[%s194_s23] sm:$0xff] %vm229_vm1, %v228_v14 }
  0x9f   : > { %426 = shalt.err (!%p423_p5)
}
  0xa0   : > { %339 = dma.vmem_to_hbm [thread:$0]  (%p541_p4), %s246_s26, 128, %s248_s27, %s232_s15  }
  0xa1 PF: > { %p345_p6 = scmp.ge.s32.totalorder %s477_s17, 2  ;;  %s259_s8 = sand.u32 1, %s457_s12  }
  0xa2   : > { %s260_s9 = scalar_lea.sflag [#allocation3], %s259_s8 }
  0xa3   : > { %p342_p7 = pnand %p345_p6, %p548_p8 }
  0xa5   : > { %p343_p9 = pneg %p342_p7 }
  0xa7   : > { %452 = dma.done.wait (%p343_p9), %s260_s9, 128  }
  0xa8   : > { %454 = vsyncadd (%p343_p9), %s260_s9, 4294967168  ;;  %s16_s17 = sadd.s32 1, %s477_s17   ;;  %s610_s12 = smov %s461_s13 }
  0xa9   : > { %p13_p10 = scmp.ge.s32.totalorder %s16_s17, 4   ;;  %s611_s13 = smov %s465_s14 }
  0xaa   : > { %s612_s14 = smov %s554_s25  ;;  %s613_s15 = smov %s473_s16 }
  0xab   : > { %s614_s16 = smov %s616_s20  ;;  %15 = sbr.rel (!%p13_p10) target bundleno = 4 (0x4), region = 70 }
  0xb0   :  { %266 = vsyncpa [#allocation3], 1 }
  0xb1   :  { %268 = vsyncpa [#allocation3 + $0x1], 1 }

</bundles_post_ra>
